<compile_context>
chip_gen: v7x
topology: tpu7x:2x2x1
jax: 0.10.0
libtpu: 0.0.40
codegen_flags: <defaults>
</compile_context>

<pallas_src>
import functools

import jax
import jax.numpy as jnp
from jax import lax
from jax.experimental import pallas as pl
from jax.experimental.pallas import tpu as pltpu


def twin_kernel(x_ref, wb_ref, bb_ref, wf_ref, bf_ref, out_ref, acc_ref,
                *, hw_total, block_hw):
    # x_ref : (1, C, THW)      bf16  -- one batch row, one spatial tile (HW on lanes)
    # wb_ref: (C, D_base)      bf16  -- synthetic base_model 1x1 conv weight (resident)
    # bb_ref: (1, D_base)      f32
    # wf_ref: (D_base, D_out)  bf16  -- fc Linear weight (resident)
    # bf_ref: (1, D_out)       f32
    # out_ref: (1, 1, D_out)   f32   -- written only on the last spatial step
    # acc_ref: (1, D_base)     f32   -- pooled-sum accumulator (VMEM scratch)
    j = pl.program_id(1)
    n_hw = pl.num_programs(1)

    @pl.when(j == 0)
    def _():
        acc_ref[...] = jnp.zeros_like(acc_ref)

    x2d = x_ref[0]                                        # (C, THW) bf16

    # base_model: pointwise conv == x2d^T @ W_base on the MXU, f32 accumulation.
    feat = lax.dot_general(
        x2d, wb_ref[...],
        dimension_numbers=(((0,), (0,)), ((), ())),
        preferred_element_type=jnp.float32)               # (THW, D_base) f32
    feat = jnp.maximum(feat + bb_ref[...], 0.0)           # bias + ReLU

    # Mask padded spatial rows of a remainder tile (static no-op when divisible).
    if hw_total % block_hw != 0:
        pos = j * block_hw + lax.broadcasted_iota(jnp.int32, feat.shape, 0)
        feat = jnp.where(pos < hw_total, feat, 0.0)

    # AdaptiveAvgPool2d(1): accumulate spatial sum; scale by 1/HW at the end.
    acc_ref[...] += jnp.sum(feat, axis=0, keepdims=True)  # (1, D_base)

    @pl.when(j == n_hw - 1)
    def _():
        pooled = acc_ref[...] * (1.0 / hw_total)          # (1, D_base) f32
        out = jnp.dot(pooled, wf_ref[...].astype(jnp.float32),
                      preferred_element_type=jnp.float32) # (1, D_out)
        out = jnp.maximum(out + bf_ref[...], 0.0)         # fc bias + ReLU
        out_ref[...] = out[None].astype(out_ref.dtype)    # (1, 1, D_out)


def transfer_twin_forward(x_nchw, w_base, b_base, w_fc, b_fc,
                          *, block_hw=512, compute_dtype=jnp.bfloat16):
    """TransferTwinNetwork.forward.

    x_nchw : (B, C, H, W) -- PyTorch NCHW input
    w_base : (C, D_base), b_base : (1, D_base)   -- synthetic base_model (1x1 conv + ReLU)
    w_fc   : (D_base, D_out), b_fc : (1, D_out)  -- fc Linear
    returns: (B, D_out) float32
    """
    B, C, H, W = x_nchw.shape
    HW = H * W
    D_base = w_base.shape[1]
    D_out = w_fc.shape[1]

    # NCHW -> (B, C, H*W) is a contiguous (free) reshape -- no HBM transpose pass.
    # NOTE: feed x already in bf16 in production so this cast is a no-op.
    x = x_nchw.reshape(B, C, HW).astype(compute_dtype)
    wb = w_base.astype(compute_dtype)
    wf = w_fc.astype(compute_dtype)
    bb = b_base.reshape(1, D_base).astype(jnp.float32)
    bf = b_fc.reshape(1, D_out).astype(jnp.float32)

    # Spatial tile: multiple of 128 lanes (or the full extent). Sized so the
    # per-buffer (x tile + feat tile) stays well under the 32 MiB scoped VMEM
    # budget; halve block_hw on v7x (64 MiB physical VMEM) for huge D_base.
    thw = min(block_hw, HW)
    if thw < HW:
        thw = max(128, (thw // 128) * 128)
        thw = min(thw, HW)
    n_hw = pl.cdiv(HW, thw)

    kernel = functools.partial(twin_kernel, hw_total=HW, block_hw=thw)

    out3 = pl.pallas_call(
        kernel,
        out_shape=jax.ShapeDtypeStruct((B, 1, D_out), jnp.float32),
        grid_spec=pltpu.PrefetchScalarGridSpec(
            num_scalar_prefetch=0,
            grid=(B, n_hw),                       # batch (parallel), HW reduction (arbitrary)
            in_specs=[
                pl.BlockSpec((1, C, thw), lambda b, j: (b, 0, j)),
                # Weights / biases: full blocks with constant index maps -> resident.
                pl.BlockSpec((C, D_base), lambda b, j: (0, 0)),
                pl.BlockSpec((1, D_base), lambda b, j: (0, 0)),
                pl.BlockSpec((D_base, D_out), lambda b, j: (0, 0)),
                pl.BlockSpec((1, D_out), lambda b, j: (0, 0)),
            ],
            out_specs=pl.BlockSpec((1, 1, D_out), lambda b, j: (b, 0, 0)),
            scratch_shapes=[pltpu.VMEM((1, D_base), jnp.float32)],
        ),
        compiler_params=pltpu.CompilerParams(
            dimension_semantics=("parallel", "arbitrary"),
            vmem_limit_bytes=32 * 1024 * 1024,
        ),
    )(x, wb, bb, wf, bf)
    return out3.reshape(B, D_out)


if __name__ == "__main__":
    # Small shapes consistent with the module (scaled down from 1280/1024).
    B, C_in, H, W = 2, 4, 16, 16
    D_base, D_out = 128, 256          # base_model_dim, output_dim

    key = jax.random.PRNGKey(0)
    k_x, k_wb, k_bb, k_wf, k_bf = jax.random.split(key, 5)

    x = jax.random.normal(k_x, (B, C_in, H, W), dtype=jnp.float32)

    # Deterministic PyTorch-style uniform(-1/sqrt(fan_in), 1/sqrt(fan_in)) init.
    lim_b = 1.0 / jnp.sqrt(jnp.float32(C_in))
    w_base = jax.random.uniform(k_wb, (C_in, D_base), jnp.float32, -lim_b, lim_b)
    b_base = jax.random.uniform(k_bb, (1, D_base), jnp.float32, -lim_b, lim_b)

    lim_f = 1.0 / jnp.sqrt(jnp.float32(D_base))
    w_fc = jax.random.uniform(k_wf, (D_base, D_out), jnp.float32, -lim_f, lim_f)
    b_fc = jax.random.uniform(k_bf, (1, D_out), jnp.float32, -lim_f, lim_f)

    # block_hw=128 so the pipelined HW reduction (grid=(B, 2)) is exercised.
    out = transfer_twin_forward(x, w_base, b_base, w_fc, b_fc, block_hw=128)
    out = jax.block_until_ready(out)

    # Pure-JAX reference mirroring the kernel's bf16-in / f32-accumulate math.
    xr = x.reshape(B, C_in, H * W).astype(jnp.bfloat16)
    wbr = w_base.astype(jnp.bfloat16)
    feat = jnp.einsum("bch,cd->bhd", xr, wbr, preferred_element_type=jnp.float32)
    feat = jnp.maximum(feat + b_base, 0.0)
    pooled = jnp.mean(feat, axis=1)                       # (B, D_base) f32
    wfr = w_fc.astype(jnp.bfloat16).astype(jnp.float32)
    ref = jnp.maximum(jnp.dot(pooled, wfr, preferred_element_type=jnp.float32) + b_fc, 0.0)

    assert out.shape == (B, D_out)
    assert jnp.allclose(out, ref, atol=2e-2, rtol=2e-2), \
        float(jnp.max(jnp.abs(out - ref)))

    print("KERNEL_OK")
</pallas_src>

<mosaic_0001>
module attributes {stable_mosaic.version = 11 : i64} {
  func.func @twin_kernel(%arg0: i32, %arg1: i32, %arg2: memref<1x4x128xbf16, #tpu.memory_space<vmem>>, %arg3: memref<4x128xbf16, #tpu.memory_space<vmem>>, %arg4: memref<1x128xf32, #tpu.memory_space<vmem>>, %arg5: memref<128x256xbf16, #tpu.memory_space<vmem>>, %arg6: memref<1x256xf32, #tpu.memory_space<vmem>>, %arg7: memref<1x1x256xf32, #tpu.memory_space<vmem>>, %arg8: memref<1x128xf32, #tpu.memory_space<vmem>>) attributes {dimension_semantics = [#tpu.dimension_semantics<parallel>, #tpu.dimension_semantics<arbitrary>], iteration_bounds = array<i64: 2, 2>, scalar_prefetch = 0 : i64, scratch_operands = 1 : i64, tpu.core_type = #tpu.core_type<tc>, window_params = [{transform_indices = @transform_0, window_bounds = array<i64: 1, 4, 128>}, {pipeline_mode = #tpu.pipeline_mode<synchronous>, transform_indices = @transform_1, window_bounds = array<i64: 4, 128>}, {pipeline_mode = #tpu.pipeline_mode<synchronous>, transform_indices = @transform_2, window_bounds = array<i64: 1, 128>}, {pipeline_mode = #tpu.pipeline_mode<synchronous>, transform_indices = @transform_3, window_bounds = array<i64: 128, 256>}, {pipeline_mode = #tpu.pipeline_mode<synchronous>, transform_indices = @transform_4, window_bounds = array<i64: 1, 256>}, {transform_indices = @transform_5, window_bounds = array<i64: 1, 1, 256>}]} {
    %c0_i32 = arith.constant 0 : i32
    %0 = arith.cmpi eq, %arg1, %c0_i32 : i32
    %1 = arith.extui %0 : i1 to i32
    %c0_i32_0 = arith.constant 0 : i32
    %2 = arith.cmpi ne, %1, %c0_i32_0 : i32
    scf.if %2 {
      %cst_14 = arith.constant 0.000000e+00 : f32
      %20 = vector.broadcast %cst_14 : f32 to vector<1x128xf32>
      %c0_15 = arith.constant 0 : index
      %c0_16 = arith.constant 0 : index
      %21 = vector.load %arg8[%c0_15, %c0_16] : memref<1x128xf32, #tpu.memory_space<vmem>>, vector<1x128xf32>
      tpu.vector_store %arg8[%c0_15, %c0_16], %20 {strides = array<i32>} : memref<1x128xf32, #tpu.memory_space<vmem>>, vector<1x128xf32>,
    } else {
    }
    %c0 = arith.constant 0 : index
    %c0_1 = arith.constant 0 : index
    %c0_2 = arith.constant 0 : index
    %3 = vector.load %arg2[%c0, %c0_1, %c0_2] : memref<1x4x128xbf16, #tpu.memory_space<vmem>>, vector<1x4x128xbf16>
    %4 = vector.shape_cast %3 : vector<1x4x128xbf16> to vector<4x128xbf16>
    %c0_3 = arith.constant 0 : index
    %c0_4 = arith.constant 0 : index
    %5 = vector.load %arg3[%c0_3, %c0_4] : memref<4x128xbf16, #tpu.memory_space<vmem>>, vector<4x128xbf16>
    %cst = arith.constant dense<0.000000e+00> : vector<128x128xf32>
    %6 = tpu.matmul %4, %5, %cst {dimension_numbers = #tpu.dot_dimension_numbers<[0], [0], [1], [1], [0, 1, 1, 1], [], []>} : vector<4x128xbf16>, vector<4x128xbf16>, vector<128x128xf32> -> vector<128x128xf32>
    %c0_5 = arith.constant 0 : index
    %c0_6 = arith.constant 0 : index
    %7 = vector.load %arg4[%c0_5, %c0_6] : memref<1x128xf32, #tpu.memory_space<vmem>>, vector<1x128xf32>
    %8 = vector.broadcast %7 : vector<1x128xf32> to vector<128x128xf32>
    %9 = arith.addf %6, %8 : vector<128x128xf32>
    %cst_7 = arith.constant 0.000000e+00 : f32
    %10 = vector.broadcast %cst_7 : f32 to vector<128x128xf32>
    %11 = arith.maximumf %9, %10 : vector<128x128xf32>
    %c0_8 = arith.constant 0 : index
    %c0_9 = arith.constant 0 : index
    %12 = vector.load %arg8[%c0_8, %c0_9] : memref<1x128xf32, #tpu.memory_space<vmem>>, vector<1x128xf32>
    %cst_10 = arith.constant dense<0.000000e+00> : vector<128xf32>
    %13 = vector.multi_reduction <add>, %11, %cst_10 [0] : vector<128x128xf32> to vector<128xf32>
    %14 = vector.shape_cast %13 : vector<128xf32> to vector<1x128xf32>
    %15 = arith.addf %12, %14 : vector<1x128xf32>
    %c0_11 = arith.constant 0 : index
    %c0_12 = arith.constant 0 : index
    %16 = vector.load %arg8[%c0_11, %c0_12] : memref<1x128xf32, #tpu.memory_space<vmem>>, vector<1x128xf32>
    tpu.vector_store %arg8[%c0_11, %c0_12], %15 {strides = array<i32>} : memref<1x128xf32, #tpu.memory_space<vmem>>, vector<1x128xf32>,
    %c1_i32 = arith.constant 1 : i32
    %17 = arith.cmpi eq, %arg1, %c1_i32 : i32
    %18 = arith.extui %17 : i1 to i32
    %c0_i32_13 = arith.constant 0 : i32
    %19 = arith.cmpi ne, %18, %c0_i32_13 : i32
    scf.if %19 {
      %c0_14 = arith.constant 0 : index
      %c0_15 = arith.constant 0 : index
      %20 = vector.load %arg8[%c0_14, %c0_15] : memref<1x128xf32, #tpu.memory_space<vmem>>, vector<1x128xf32>
      %cst_16 = arith.constant 3.906250e-03 : f32
      %21 = vector.broadcast %cst_16 : f32 to vector<1x128xf32>
      %22 = arith.mulf %20, %21 : vector<1x128xf32>
      %c0_17 = arith.constant 0 : index
      %c0_18 = arith.constant 0 : index
      %23 = vector.load %arg5[%c0_17, %c0_18] : memref<128x256xbf16, #tpu.memory_space<vmem>>, vector<128x256xbf16>
      %24 = arith.extf %23 : vector<128x256xbf16> to vector<128x256xf32>
      %cst_19 = arith.constant dense<0.000000e+00> : vector<1x256xf32>
      %25 = tpu.matmul %22, %24, %cst_19 {dimension_numbers = #tpu.dot_dimension_numbers<[1], [0], [0], [1], [0, 0, 1, 1], [], []>} : vector<1x128xf32>, vector<128x256xf32>, vector<1x256xf32> -> vector<1x256xf32>
      %c0_20 = arith.constant 0 : index
      %c0_21 = arith.constant 0 : index
      %26 = vector.load %arg6[%c0_20, %c0_21] : memref<1x256xf32, #tpu.memory_space<vmem>>, vector<1x256xf32>
      %27 = arith.addf %25, %26 : vector<1x256xf32>
      %cst_22 = arith.constant 0.000000e+00 : f32
      %28 = vector.broadcast %cst_22 : f32 to vector<1x256xf32>
      %29 = arith.maximumf %27, %28 : vector<1x256xf32>
      %30 = vector.shape_cast %29 : vector<1x256xf32> to vector<1x1x256xf32>
      %c0_23 = arith.constant 0 : index
      %c0_24 = arith.constant 0 : index
      %c0_25 = arith.constant 0 : index
      %31 = vector.load %arg7[%c0_23, %c0_24, %c0_25] : memref<1x1x256xf32, #tpu.memory_space<vmem>>, vector<1x1x256xf32>
      tpu.vector_store %arg7[%c0_23, %c0_24, %c0_25], %30 {strides = array<i32>} : memref<1x1x256xf32, #tpu.memory_space<vmem>>, vector<1x1x256xf32>,
    } else {
    }
    return
  }
  func.func @transform_0(%arg0: i32, %arg1: i32) -> (i32, i32, i32) {
    %c0_i32 = arith.constant 0 : i32
    %c0_i32_0 = arith.constant 0 : i32
    return %arg0, %c0_i32, %arg1 : i32, i32, i32
  }
  func.func @transform_1(%arg0: i32, %arg1: i32) -> (i32, i32) {
    %c0_i32 = arith.constant 0 : i32
    %c0_i32_0 = arith.constant 0 : i32
    %c0_i32_1 = arith.constant 0 : i32
    return %c0_i32, %c0_i32_0 : i32, i32
  }
  func.func @transform_2(%arg0: i32, %arg1: i32) -> (i32, i32) {
    %c0_i32 = arith.constant 0 : i32
    %c0_i32_0 = arith.constant 0 : i32
    %c0_i32_1 = arith.constant 0 : i32
    return %c0_i32, %c0_i32_0 : i32, i32
  }
  func.func @transform_3(%arg0: i32, %arg1: i32) -> (i32, i32) {
    %c0_i32 = arith.constant 0 : i32
    %c0_i32_0 = arith.constant 0 : i32
    %c0_i32_1 = arith.constant 0 : i32
    return %c0_i32, %c0_i32_0 : i32, i32
  }
  func.func @transform_4(%arg0: i32, %arg1: i32) -> (i32, i32) {
    %c0_i32 = arith.constant 0 : i32
    %c0_i32_0 = arith.constant 0 : i32
    %c0_i32_1 = arith.constant 0 : i32
    return %c0_i32, %c0_i32_0 : i32, i32
  }
  func.func @transform_5(%arg0: i32, %arg1: i32) -> (i32, i32, i32) {
    %c0_i32 = arith.constant 0 : i32
    %c0_i32_0 = arith.constant 0 : i32
    %c0_i32_1 = arith.constant 0 : i32
    return %arg0, %c0_i32, %c0_i32_0 : i32, i32, i32
  }
}

</mosaic_0001>

<bundles_post_ra>
// kernel: tpu_custom_call.1
= control target key start
LH: loop header
LB: loop body
LE: loop exit
PB: predicated region body
PF: predicated region fallthrough
CT: control target
= control target key end

     0   :  { %s1493_s0 = inlined_call_operand.hbm [shape: bf16[2,4,256], index: 0, kind: input, shape index: {}]   ;;  %s1494_s1 = inlined_call_operand.vmem [shape: bf16[4,128], index: 1, kind: input, shape index: {}]   ;;  %s1495_s2 = inlined_call_operand.vmem [shape: f32[1,128], index: 2, kind: input, shape index: {}]   ;;  %s1496_s3 = inlined_call_operand.hbm [shape: bf16[128,256], index: 3, kind: input, shape index: {}]   ;;  %s1497_s4 = inlined_call_operand.vmem [shape: f32[1,256], index: 4, kind: input, shape index: {}]   ;;  %s1498_s5 = inlined_call_operand.hbm [shape: f32[2,1,256], index: 5, kind: output, shape index: {}]  }
   0x1   :  { %1510 = sst [smem:[#allocation17_spill]] %s1494_s1 }
   0x2   :  { %1511 = sst [smem:[#allocation18_spill]] %s1495_s2 }
   0x3   :  { %1512 = sst [smem:[#allocation19_spill]] %s1496_s3 }
   0x4   :  { %1513 = sst [smem:[#allocation20_spill]] %s1497_s4 }
   0x5   :  { %1514 = sst [smem:[#allocation21_spill]] %s1498_s5 }
   0x6   :  { %10 = vsyncpa [#allocation4], 0 }
   0x7   :  { %12 = vsyncpa [#allocation4 + $0x1], 0 }
   0x8   :  { %13 = vsyncpa [#allocation7], 0 }
   0x9   :  { %14 = vsyncpa [#allocation5], 0 }
   0xa   :  { %16 = vsyncpa [#allocation5 + $0x1], 0  ;;  %s1213_s18 = smov 0   ;;  %s1215_s19 = smov 0  }
   0xb   :  { %s1217_s20 = smov 0   ;;  %s1219_s21 = smov 0  }
   0xc   :  { %s1221_s22 = smov 0   ;;  %s1223_s23 = smov 0  }
   0xd   :  { %s1225_s24 = smov 0   ;;  %s1227_s25 = smov 0  }
   0xe   :  { %s1229_s26 = smov 0   ;;  %s1231_s27 = smov 0  }
   0xf   :  { %s1233_s28 = smov 0  }
  0x10 LB: > { %1515 = sst [smem:[#allocation12_spill]] %s1133_s18  ;;  %s738_s29 = sadd.s32 4294967295, %s1173_s28   ;;  %s1173_s28 = sphi %s1233_s28, %s22_s28   ;;  %s1169_s27 = sphi %s1231_s27, %s1552_s27   ;;  %s1165_s26 = sphi %s1229_s26, %s1551_s26   ;;  %s1161_s25 = sphi %s1227_s25, %s1550_s25   ;;  %s1157_s24 = sphi %s1225_s24, %s1549_s24   ;;  %s1153_s23 = sphi %s1223_s23, %s1548_s23   ;;  %s1149_s22 = sphi %s1221_s22, %s1547_s22   ;;  %s1145_s21 = sphi %s1219_s21, %s1546_s21   ;;  %s1141_s20 = sphi %s1217_s20, %s1545_s20   ;;  %s1137_s19 = sphi %s1215_s19, %s1544_s19   ;;  %s1133_s18 = sphi %s1213_s18, %s1543_s18  }
  0x11   : > { %1516 = sst [smem:[#allocation13_spill]] %s1161_s25  ;;  %s739_s30 = sadd.s32 4294967294, %s1173_s28  }
  0x12   : > { %p56_p0 = scmp.ne.s32.totalorder %s1149_s22, %s1145_s21  ;;  %p1269_p1 = scmp.eq.s32.totalorder %s738_s29, 0 }
  0x13   : > { %p163_p2 = scmp.ne.s32.totalorder %s1141_s20, %s1137_s19  ;;  %p164_p3 = scmp.eq.s32.totalorder %s738_s29, 3 }
  0x14   : > { %s1517_s6 = scalar_select %p1269_p1, 1, 0 }
  0x15   : > { %p1277_p4 = por %p1269_p1, %p56_p0  ;;  %p169_p5 = scmp.ne.s32.totalorder %s1137_s19, %s1133_s18 }
  0x16   : > { %p1283_p6 = por %p164_p3, %p163_p2  ;;  %p170_p7 = scmp.eq.s32.totalorder %s739_s30, 3 }
  0x17   : > { %s1518_s7 = scalar_select %p1277_p4, 1, 0 }
  0x18   : > { %s1519_s8 = scalar_select %p1283_p6, 1, 0 }
  0x19   : > { %p740_p8 = scmp.ge.s32.totalorder %s1173_s28, 1  ;;  %p177_p9 = scmp.lt.s32.totalorder %s1173_s28, 5 }
  0x1a   : > { %1520 = sst [smem:[#allocation14_spill]] %s1519_s8  ;;  %p1289_p10 = por %p170_p7, %p169_p5 }
  0x1b   : > { %p1293_p11 = pnand %p740_p8, %p177_p9  ;;  %s1175_s11 = smov [#allocation6]  }
  0x1c   : > { %s1521_s9 = scalar_select %p1289_p10, 1, 0 }
  0x1d   : > { %s1523_s10 = scalar_select %p1293_p11, 1, 0 }
  0x1e   : > { %1522 = sst [smem:[#allocation15_spill]] %s1521_s9  ;;  %s195_s12 = sshll.u32 %s1175_s11, 4  ;;  %s196_s12 = int_to_ptr.vmem [resolvable:$true] %s195_s12 }
  0x1f   : > { %p854_p12 = pneg %p1293_p11  ;;  %s1525_s3 = sld [smem:[#allocation19_spill]] }
  0x21   : > { %p1301_p13 = pnand %p854_p12, %p1269_p1 }
  0x23   : > { %p991_p2 = pneg %p1301_p13 }
  0x25   : > { %s989_s16 = scalar_lea.hbm %s1525_s3, 2048 }
  0x26   : > { %p990_p0 = scmp.ne.s32.totalorder %s1525_s3, %s989_s16  ;;  %p996_p7 = scmp.lt.u32.totalorder %s989_s16, %s1525_s3 }
  0x28   : > { %p992_p3 = pnand %p991_p2, %p990_p0 }
  0x2a   : > { %p993_p5 = pneg %p992_p3 }
  0x2c   : > { %p998_p8 = pnand %p996_p7, %p993_p5 }
  0x2e   : > { %1001 = shalt.err (!%p998_p8)
}
  0x2f   : > { %s1002_s11 = scalar_lea.vmem %s196_s12, 2048  ;;  %p1010_p6 = scmp.lt.s32.totalorder %s196_s12, %s196_s12 }
  0x30   : > { %p1003_p9 = scmp.ne.s32.totalorder %s196_s12, %s1002_s11  ;;  %p1011_p1 = scmp.lt.s32.totalorder %s1002_s11, %s1002_s11 }
  0x32   : > { %p1005_p12 = pnand %p1003_p9, %p991_p2  ;;  %p1012_p4 = por %p1011_p1, %p1010_p6 }
  0x34   : > { %p1006_p10 = pneg %p1005_p12 }
  0x36   : > { %p1013_p11 = pnand %p1012_p4, %p1006_p10 }
  0x38   : > { %1016 = shalt.err (!%p1013_p11)
}
  0x39   : > { %s1176_s14 = smov 128   ;;  %s1177_s15 = smov 8  }
  0x3a   : > { %857 = dma.hbm_to_vmem [thread:$0]  (!%p1301_p13), %s1525_s3, 2048, %s196_s12, [#allocation7], %s1176_s14, %s1176_s14, %s1177_s15  }
  0x3b   : > { %s31_s21 = sadd.s32 1, %s1165_s26  ;;  %s34_s29 = sadd.s32 1, %s1169_s27 }
  0x3c   : > { %p32_p1 = scmp.ge.s32.totalorder %s31_s21, 2  ;;  %s43_s30 = sadd.s32 1, %s1153_s23 }
  0x3d   : > { %p50_p4 = scmp.ne.s32.totalorder %s1153_s23, %s1149_s22  ;;  %p51_p6 = scmp.eq.s32.totalorder %s1173_s28, 0 }
  0x3e   : > { %s1554_s21 = smov (%p32_p1, %s31_s21), 0  ;;  %s1556_s29 = smov (!%p32_p1, %s34_s29), %s1169_s27 }
  0x3f   : > { %1526 = sst [smem:[#allocation16_spill]] %s1554_s21  ;;  %s39_s13 = ssub.s32 %s1165_s26, %s1554_s21 }
  0x40   : > { %p1332_p10 = por %p51_p6, %p50_p4  ;;  %p36_p11 = scmp.ge.s32.totalorder %s1556_s29, 2 }
  0x41   : > { %s153_s12 = sadd.s32 1, %s1141_s20  ;;  %p867_p13 = scmp.lt.s32.totalorder %s1173_s28, 4 }
  0x42   : > { %s212_s14 = sand.u32 1, %s1153_s23   ;;  %s1558_s29 = smov (%p36_p11, %s1556_s29), 0 }
  0x43   : > { %s743_s15 = sshll.u32 %s212_s14, 1  ;;  %s38_s16 = ssub.s32 %s1169_s27, %s1558_s29 }
  0x44   : > { %s40_s17 = sor.u32 %s39_s13, %s38_s16  ;;  %p151_p0 = scmp.eq.s32.totalorder %s38_s16, 0 }
  0x45   : > { %p41_p2 = scmp.eq.s32.totalorder %s40_s17, 0  ;;  %s744_s3 = sshll.u32 %s1169_s27, 1 }
  0x46   : > { %s1345_s21 = scalar_select %p151_p0, %s1141_s20, %s153_s12  }
  0x47   : > { %s1348_s9 = scalar_select %p41_p2, %s1153_s23, %s43_s30  }
  0x48   : > { %s221_s18 = sadd.s32 %s1165_s26, %s744_s3  ;;  %s216_s5 = scalar_lea.vmem [#allocation3], %s743_s15 }
  0x49   : > { %s225_s8 = sshll.u32 %s216_s5, 4  ;;  %s745_s25 = sshll.u32 %s221_s18, 5  ;;  %s1351_s8 = int_to_ptr.vmem [resolvable:$true] %s225_s8 }
  0x4a   : > { %s1356_s1 = scalar_lea.hbm %s1493_s0, %s745_s25  ;;  %p1362_p3 = pnand %p867_p13, %p1332_p10 }
  0x4b   : > { %s213_s3 = scalar_lea.sflag [#allocation4], %s212_s14  ;;  %s1017_s5 = scalar_lea.hbm %s1356_s1, 32 }
  0x4c   : > { %p1018_p5 = scmp.ne.s32.totalorder %s1356_s1, %s1017_s5  ;;  %p1019_p7 = pneg %p1362_p3 }
  0x4d   : > { %s1022_s18 = scalar_lea.hbm %s1493_s0, 128  ;;  %p1023_p12 = scmp.lt.u32.totalorder %s1356_s1, %s1493_s0 }
  0x4e   : > { %p1020_p8 = pnand %p1019_p7, %p1018_p5  ;;  %p1024_p1 = scmp.lt.u32.totalorder %s1022_s18, %s1017_s5 }
  0x4f   : > { %p1026_p6 = scmp.lt.u32.totalorder %s1017_s5, %s1356_s1 }
  0x50   : > { %p1021_p9 = pneg %p1020_p8  ;;  %p1025_p4 = por %p1024_p1, %p1023_p12 }
  0x52   : > { %p1027_p10 = por %p1026_p6, %p1025_p4 }
  0x54   : > { %p1028_p11 = pnand %p1027_p10, %p1021_p9 }
  0x56   : > { %1031 = shalt.err (!%p1028_p11)
}
  0x57   : > { %s1032_s11 = scalar_lea.vmem %s1351_s8, 32  ;;  %s1178_s12 = smov [#allocation3]  }
  0x58   : > { %p1033_p13 = scmp.ne.s32.totalorder %s1351_s8, %s1032_s11  ;;  %s1037_s14 = sshll.u32 %s1178_s12, 4  ;;  %s1038_s14 = int_to_ptr.vmem [resolvable:$false] %s1037_s14 }
  0x59   : > { %s1039_s15 = scalar_lea.vmem %s1038_s14, 64  ;;  %p1040_p5 = scmp.lt.s32.totalorder %s1351_s8, %s1038_s14 }
  0x5a   : > { %p1035_p0 = pnand %p1033_p13, %p1019_p7  ;;  %p1041_p8 = scmp.lt.s32.totalorder %s1039_s15, %s1032_s11 }
  0x5c   : > { %p1036_p2 = pneg %p1035_p0  ;;  %p1042_p12 = por %p1041_p8, %p1040_p5 }
  0x5e   : > { %p1043_p1 = pnand %p1042_p12, %p1036_p2 }
  0x60   : > { %1046 = shalt.err (!%p1043_p1)
}
  0x61   : > { %861 = dma.hbm_to_vmem [thread:$0]  (!%p1362_p3), %s1356_s1, 32, %s1351_s8, %s213_s3  }
  0x62   : > { %p1529_p9 = scmp.ne.s32.totalorder %s1523_s10, 0 }
  0x63   : > { %s236_s16 = sand.u32 (!%p1529_p9), 1, %s1149_s22   ;;  %p1530_p7 = scmp.ne.s32.totalorder (!%p1529_p9), %s1518_s7, 0 }
  0x64   : > { %234 = sbr.rel (%p1529_p9) target bundleno = 752 (0x2f0), region = 40  ;;  %s747_s17 = sshll.u32 (!%p1529_p9), %s236_s16, 1 }
  0x65   : > { %s237_s5 = scalar_lea.sflag (!%p1529_p9), [#allocation4], %s236_s16  ;;  %s240_s2 = scalar_lea.vmem (!%p1529_p9), [#allocation3], %s747_s17 }
  0x6b   : > { %1120 = dma.done.wait (%p1530_p7), %s237_s5, 32  }
  0x6c   : > { %1122 = vsyncadd (%p1530_p7), %s237_s5, 4294967264  ;;  %p1531_p4 = scmp.ne.s32.totalorder %s1517_s6, 0 }
  0x6e   : > { %1124 = dma.done.wait (%p1531_p4), [#allocation7], 2048  }
  0x6f   : > { %1126 = vsyncadd (%p1531_p4), [#allocation7], 4294965248  ;;  %s268_s1 = sand.u32 1, %s1137_s19   ;;  %p750_p3 = scmp.ne.s32.totalorder %s1157_s24, 0 }
  0x70   : > { %s1405_s8 = sshll.u32 %s268_s1, 1  ;;  %v1179_v0 = vmov (!%p750_p3), 0.0  }
  0x71   : > { %s270_s10 = scalar_lea.vmem [#allocation8], %s1405_s8  ;;  %275 = sbr.rel (%p750_p3) target bundleno = 120 (0x78), region = 52  ;;  %276 = vst [vmem:[#allocation2] sm:$0x1] (!%p750_p3), %v1179_v0 }
  0x78 PF: > { %v277_v1 = vld [vmem:[%s240_s2] sm:$0x3]  ;;  %s1532_s3 = sld [smem:[#allocation17_spill]]  ;;  %vm327_vm0 = vcmask 1041408   ;;  %vm302_vm1 = vcmask 31744   ;;  %s1533_s18 = sld [smem:[#allocation18_spill]] }
  0x79   : > { %286 = vxpose.xlu0.c.b16.start.end [1/1] (short) %v277_v1, 128  ;;  %p760_p6 = scmp.ne.s32.totalorder %s1157_s24, 1 }
  0x7a   : > { %s1534_s13 = sld [smem:[#allocation20_spill]] (!%p760_p6) }
  0x7e   : > { %v278_v2 = vld [vmem:[%s1532_s3] sm:$0x3] }
  0x7f   : > { %828 = vmatprep.subr.msk.bf16.mxu0 %vm327_vm0, %v278_v2  ;;  %v329_v3 = vsel %vm327_vm0, %v278_v2, 0  ;;  %829 = vmatprep.subr.msk.bf16.mxu1 %vm327_vm0, %v278_v2  ;;  %v751_v12 = vld [vmem:[%s1533_s18] ss:$0 sm:$0xff] }
  0x80   : > { %777 = vmatpush3.bf16.msra.mxu0 %v329_v3  ;;  %827 = vmatpush3.bf16.msra.mxu1 %v329_v3 }
  0xdf   : > { %v294_v4 = vpop.trf.xlu0 }
  0xe0   : > { %778 = vmatprep.mubr.msk.bf16.mxu0 %vm302_vm1, %v294_v4 }
  0xe3   : > { %v295_v5 = vpop.trf.xlu0 }
  0xe4   : > { %779 = vmatmul.mubr.msk.bf16.vlgmr.msra.gmra.mrb[0].mxu0 %vm302_vm1, %v295_v5 }
  0xe7   : > { %v296_v6 = vpop.trf.xlu0 }
  0xe8   : > { %782 = vmatprep.mubr.msk.bf16.mxu0 %vm302_vm1, %v296_v6 }
  0xeb   : > { %v297_v7 = vpop.trf.xlu0 }
  0xec   : > { %783 = vmatmul.mubr.msk.bf16.gmra.mrb[4].mxu0 %vm302_vm1, %v297_v7 }
  0xef   : > { %v298_v8 = vpop.trf.xlu0 }
  0xf0   : > { %786 = vmatprep.mubr.msk.bf16.mxu1 %vm302_vm1, %v298_v8 }
  0xf3   : > { %v299_v9 = vpop.trf.xlu0 }
  0xf4   : > { %787 = vmatmul.mubr.msk.bf16.vlgmr.msra.gmra.mrb[0].mxu1 %vm302_vm1, %v299_v9 }
  0xf7   : > { %v300_v10 = vpop.trf.xlu0 }
  0xf8   : > { %790 = vmatprep.mubr.msk.bf16.mxu1 %vm302_vm1, %v300_v10 }
  0xfb   : > { %v301_v11 = vpop.trf.xlu0 }
  0xfc   : > { %791 = vmatmul.mubr.msk.bf16.gmra.mrb[4].mxu1 %vm302_vm1, %v301_v11 }
 0x1b7   : > { %v780_v13 = vpop.f32.mrb[0].mxu0 }
 0x1b8   : > { %v365_v14 = vpop.f32.mrb[1].mxu0  ;;  %v374_v18 = vadd.f32 %v780_v13, %v751_v12 }
 0x1b9   : > { %v366_v15 = vadd.f32 %v751_v12, %v365_v14  ;;  %v781_v16 = vpop.f32.mrb[2].mxu0 }
 0x1ba   : > { %v368_v17 = vpop.f32.mrb[3].mxu0  ;;  %v377_v21 = vadd.f32 %v781_v16, %v751_v12  ;;  %v430_v23 = vmax.f32 %v374_v18, 0.0  ;;  %v444_v18 = vld [vmem:[#allocation2] sm:$0x1] }
 0x1bb   : > { %v369_v19 = vadd.f32 %v751_v12, %v368_v17  ;;  %v428_v20 = vmax.f32 %v366_v15, 0.0 }
 0x1bc   : > { %v431_v27 = vmax.f32 %v377_v21, 0.0  ;;  %v965_v21 = vld [vmem:[#allocation6 + $0x4] ss:$8 sps:$4 sm:$0xff] (!%p760_p6)  }
 0x1bd   : > { %v429_v22 = vmax.f32 %v369_v19, 0.0  ;;  %795 = vmatprep.subr.bf16.mxu0 (!%p760_p6), %v965_v21 }
 0x1bf   : > { %v445_v24 = vadd.f32 %v429_v22, %v428_v20  ;;  %v784_v25 = vpop.f32.mrb[4].mxu0  ;;  %v1180_v22 = vmov (!%p760_p6), 0.0  }
 0x1c0   : > { %v381_v26 = vpop.f32.mrb[5].mxu0  ;;  %v390_v32 = vadd.f32 %v784_v25, %v751_v12  ;;  %598 = vmatprep.mubr.f32.mxu0 (!%p760_p6), %v1180_v22  ;;  %v971_v25 = vld [vmem:[#allocation6 + $0x24] ss:$8 sps:$4 sm:$0xff] (!%p760_p6)  }
 0x1c1   : > { %v446_v28 = vadd.f32 %v445_v24, %v430_v23  ;;  %v382_v29 = vadd.f32 %v751_v12, %v381_v26  ;;  %v785_v30 = vpop.f32.mrb[6].mxu0  ;;  %v968_v23 = vld [vmem:[#allocation6 + $0x14] ss:$8 sps:$4 sm:$0xff] (!%p760_p6)   ;;  %v970_v24 = vld [vmem:[#allocation6 + $0x10] ss:$8 sps:$4 sm:$0xff] (!%p760_p6)  }
 0x1c2   : > { %v384_v31 = vpop.f32.mrb[7].mxu0  ;;  %v393_v37 = vadd.f32 %v785_v30, %v751_v12  ;;  %v434_v39 = vmax.f32 %v390_v32, 0.0  ;;  %v973_v26 = vld [vmem:[#allocation6 + $0x20] ss:$8 sps:$4 sm:$0xff] (!%p760_p6)   ;;  %v982_v32 = vld [vmem:[#allocation6 + $0x50] ss:$8 sps:$4 sm:$0xff] (!%p760_p6)  }
 0x1c3   : > { %v432_v33 = vmax.f32 %v382_v29, 0.0  ;;  %v447_v34 = vadd.f32 %v446_v28, %v431_v27  ;;  %v385_v35 = vadd.f32 %v751_v12, %v384_v31  ;;  %v974_v27 = vld [vmem:[#allocation6 + $0x34] ss:$8 sps:$4 sm:$0xff] (!%p760_p6)   ;;  %v976_v28 = vld [vmem:[#allocation6 + $0x30] ss:$8 sps:$4 sm:$0xff] (!%p760_p6)  }
 0x1c4   : > { %v435_v43 = vmax.f32 %v393_v37, 0.0  ;;  %v977_v29 = vld [vmem:[#allocation6 + $0x44] ss:$8 sps:$4 sm:$0xff] (!%p760_p6)   ;;  %v979_v30 = vld [vmem:[#allocation6 + $0x40] ss:$8 sps:$4 sm:$0xff] (!%p760_p6)  }
 0x1c5   : > { %v448_v36 = vadd.f32 %v447_v34, %v432_v33  ;;  %v433_v38 = vmax.f32 %v385_v35, 0.0  ;;  %v980_v31 = vld [vmem:[#allocation6 + $0x54] ss:$8 sps:$4 sm:$0xff] (!%p760_p6)   ;;  %v983_v33 = vld [vmem:[#allocation6 + $0x64] ss:$8 sps:$4 sm:$0xff] (!%p760_p6)  }
 0x1c6   : > { %v985_v34 = vld [vmem:[#allocation6 + $0x60] ss:$8 sps:$4 sm:$0xff] (!%p760_p6)   ;;  %v986_v35 = vld [vmem:[#allocation6 + $0x74] ss:$8 sps:$4 sm:$0xff] (!%p760_p6)  }
 0x1c7   : > { %v449_v40 = vadd.f32 %v448_v36, %v433_v38  ;;  %v788_v41 = vpop.f32.mrb[0].mxu1  ;;  %v988_v36 = vld [vmem:[#allocation6 + $0x70] ss:$8 sps:$4 sm:$0xff] (!%p760_p6)  }
 0x1c8   : > { %v397_v42 = vpop.f32.mrb[1].mxu1  ;;  %v406_v48 = vadd.f32 %v788_v41, %v751_v12 }
 0x1c9   : > { %v450_v44 = vadd.f32 %v449_v40, %v434_v39  ;;  %v398_v45 = vadd.f32 %v751_v12, %v397_v42  ;;  %v789_v46 = vpop.f32.mrb[2].mxu1  ;;  %v524_v39 = vlaneseq (!%p760_p6)  ;;  %v522_v42 = vld [vmem:[%s1534_s13] sm:$0x3] (!%p760_p6) }
 0x1ca   : > { %v400_v47 = vpop.f32.mrb[3].mxu1  ;;  %v409_v53 = vadd.f32 %v789_v46, %v751_v12  ;;  %v438_v55 = vmax.f32 %v406_v48, 0.0 }
 0x1cb   : > { %v436_v49 = vmax.f32 %v398_v45, 0.0  ;;  %v451_v50 = vadd.f32 %v450_v44, %v435_v43  ;;  %v401_v51 = vadd.f32 %v751_v12, %v400_v47  ;;  %v525_v40 = vshrl.u32 (!%p760_p6), %v524_v39, 7 }
 0x1cc   : > { %v439_v59 = vmax.f32 %v409_v53, 0.0  ;;  %v1181_v44 = vmov (!%p760_p6), 1966171168   ;;  %vm627_vm2 = vcmp.lt.s32.totalorder (!%p760_p6), %v524_v39, 256 }
 0x1cd   : > { %v452_v52 = vadd.f32 %v451_v50, %v436_v49  ;;  %v437_v54 = vmax.f32 %v401_v51, 0.0  ;;  %v526_v41 = vsub.s32 (!%p760_p6), 0, %v525_v40  ;;  %v530_v43 = vsub.s32 (!%p760_p6), 1, %v525_v40 }
 0x1ce   : > { %v611_v45 = vunpack.c.l.s4 (!%p760_p6), %v1181_v44 }
 0x1cf   : > { %v453_v56 = vadd.f32 %v452_v52, %v437_v54  ;;  %v792_v57 = vpop.f32.mrb[4].mxu1  ;;  %v527_v46 = vrot.slane (!%p760_p6), %v522_v42, %v526_v41  ;;  %v531_v47 = vrot.slane (!%p760_p6), %v522_v42, %v530_v43 }
 0x1d0   : > { %v413_v58 = vpop.f32.mrb[5].mxu1  ;;  %v422_v0 = vadd.f32 %v792_v57, %v751_v12  ;;  %v612_v49 = vunpack.c.0.s8 (!%p760_p6), %v611_v45 }
 0x1d1   : > { %v454_v60 = vadd.f32 %v453_v56, %v438_v55  ;;  %v414_v61 = vadd.f32 %v751_v12, %v413_v58  ;;  %v793_v62 = vpop.f32.mrb[6].mxu1 }
 0x1d2   : > { %v416_v63 = vpop.f32.mrb[7].mxu1  ;;  %v425_v5 = vadd.f32 %v793_v62, %v751_v12  ;;  %v442_v7 = vmax.f32 %v422_v0, 0.0  ;;  %v615_v55 = vsub.s32 (!%p760_p6), %v612_v49, %v525_v40 }
 0x1d3   : > { %v440_v1 = vmax.f32 %v414_v61, 0.0  ;;  %v455_v2 = vadd.f32 %v454_v60, %v439_v59  ;;  %v417_v3 = vadd.f32 %v751_v12, %v416_v63  ;;  %v967_v12 = vld [vmem:[#allocation6] ss:$8 sps:$4 sm:$0xff] (!%p760_p6)  }
 0x1d4   : > { %v443_v9 = vmax.f32 %v425_v5, 0.0  ;;  %797 = vmatpush1.bf16.msra.mxu0 (!%p760_p6), %v967_v12 }
 0x1d5   : > { %v456_v4 = vadd.f32 %v455_v2, %v440_v1  ;;  %v441_v6 = vmax.f32 %v417_v3, 0.0  ;;  %799 = vmatprep.subr.bf16.mxu0 (!%p760_p6), %v968_v23 }
 0x1d7   : > { %v457_v8 = vadd.f32 %v456_v4, %v441_v6 }
 0x1d8   : > { %801 = vmatpush1.bf16.msra.mxu0 (!%p760_p6), %v970_v24 }
 0x1d9   : > { %v458_v10 = vadd.f32 %v457_v8, %v442_v7  ;;  %803 = vmatprep.subr.bf16.mxu0 (!%p760_p6), %v971_v25 }
 0x1db   : > { %v459_v11 = vadd.f32 %v458_v10, %v443_v9 }
 0x1dc   : > { %805 = vmatpush1.bf16.msra.mxu0 (!%p760_p6), %v973_v26 }
 0x1dd   : > { %v460_v13 = vrot.slane %v459_v11, 4  ;;  %807 = vmatprep.subr.bf16.mxu0 (!%p760_p6), %v974_v27 }
 0x1df   : > { %v461_v14 = vadd.f32 %v460_v13, %v459_v11 }
 0x1e0   : > { %809 = vmatpush1.bf16.msra.mxu0 (!%p760_p6), %v976_v28 }
 0x1e1   : > { %v462_v15 = vrot.slane %v461_v14, 2  ;;  %811 = vmatprep.subr.bf16.mxu0 (!%p760_p6), %v977_v29 }
 0x1e3   : > { %v463_v16 = vadd.f32 %v462_v15, %v461_v14 }
 0x1e4   : > { %813 = vmatpush1.bf16.msra.mxu0 (!%p760_p6), %v979_v30 }
 0x1e5   : > { %v464_v17 = vrot.slane %v463_v16, 1  ;;  %471 = sbr.rel (%p760_p6) target bundleno = 725 (0x2d5), region = 56  ;;  %815 = vmatprep.subr.bf16.mxu0 (!%p760_p6), %v980_v31 }
 0x1e7   : > { %v465_v19 = vadd.f32 %v464_v17, %v463_v16 }
 0x1e8   : > { %817 = vmatpush1.bf16.msra.mxu0 (!%p760_p6), %v982_v32 }
 0x1e9   : > { %v466_v20 = vadd.f32 %v465_v19, %v444_v18  ;;  %819 = vmatprep.subr.bf16.mxu0 (!%p760_p6), %v983_v33 }
 0x1eb   : > { %467 = vst [vmem:[#allocation2] sm:$0x1] %v466_v20 }
 0x1ec   : > { %821 = vmatpush1.bf16.msra.mxu0 %v985_v34 }
 0x1ed   : > { %823 = vmatprep.subr.bf16.mxu0 %v986_v35 }
 0x1f0   : > { %825 = vmatpush1.bf16.msra.mxu0 %v988_v36 }
 0x1f2   : > { %v472_v37 = vld [vmem:[#allocation2] sm:$0x1] }
 0x1f3   : > { %v473_v38 = vmul.f32 0.00390625, %v472_v37 }
 0x1f5   : > { %599 = vmatmul.mubr.f32.vlgmr.msra.gmra.mrb[0].mxu0 %v473_v38 }
 0x2c8   : > { %v600_v48 = vpop.f32.mrb[0].mxu0 }
 0x2c9   : > { %v601_v50 = vadd.f32 %v600_v48, %v527_v46  ;;  %v602_v51 = vpop.f32.mrb[1].mxu0 }
 0x2ca   : > { %v603_v52 = vadd.f32 %v602_v51, %v531_v47 }
 0x2cb   : > { %v605_v53 = vmax.f32 %v601_v50, 0.0 }
 0x2cc   : > { %v606_v54 = vmax.f32 %v603_v52, 0.0 }
 0x2ce   : > { %v609_v56 = vcombine.low %v605_v53, %v606_v54 }
 0x2d0   : > { %v616_v57 = vrot.slane %v609_v56, %v615_v55 }
 0x2d2   : > { %v623_v58 = vrot.slane %v616_v57, %v615_v55 }
 0x2d4   : > { %629 = vst.msk [vmem:[%s270_s10] sm:$0x3] %vm627_vm2, %v623_v58 }
 0x2d5 PF: > { %s1535_s11 = sld [smem:[#allocation13_spill]]  ;;  %s1536_s12 = sld [smem:[#allocation14_spill]] }
 0x2d6   : > { %s1537_s17 = sld [smem:[#allocation21_spill]]  ;;  %s645_s2 = sshll.u32 %s270_s10, 4  ;;  %s646_s2 = int_to_ptr.vmem [resolvable:$true] %s645_s2 }
 0x2d7   : > { %s631_s7 = scalar_lea.sflag [#allocation5], %s268_s1  ;;  %s1047_s30 = scalar_lea.vmem %s646_s2, 32 }
 0x2d8   : > { %p1048_p10 = scmp.ne.s32.totalorder %s646_s2, %s1047_s30  ;;  %s1182_s3 = smov [#allocation8]  }
 0x2d9   : > { %s1051_s6 = sshll.u32 %s1182_s3, 4  ;;  %s1052_s6 = int_to_ptr.vmem [resolvable:$false] %s1051_s6 }
 0x2da   : > { %s1053_s4 = scalar_lea.vmem %s1052_s6, 64  ;;  %p1054_p2 = scmp.lt.s32.totalorder %s646_s2, %s1052_s6 }
 0x2db   : > { %s766_s14 = sshll.u32 %s1535_s11, 5  ;;  %p1538_p11 = scmp.ne.s32.totalorder %s1536_s12, 0 }
 0x2dc   : > { %s1433_s5 = scalar_lea.hbm %s1537_s17, %s766_s14  ;;  %p1055_p5 = scmp.lt.s32.totalorder %s1053_s4, %s1047_s30 }
 0x2dd   : > { %p1049_p13 = pnand %p1048_p10, %p1538_p11 }
 0x2de   : > { %p1056_p8 = por %p1055_p5, %p1054_p2 }
 0x2df   : > { %p1050_p0 = pneg %p1049_p13 }
 0x2e1   : > { %p1057_p12 = pnand %p1056_p8, %p1050_p0 }
 0x2e3   : > { %1060 = shalt.err (!%p1057_p12)
}
 0x2e4   : > { %s1061_s1 = scalar_lea.hbm %s1433_s5, 32  ;;  %s1065_s18 = scalar_lea.hbm %s1537_s17, 64 }
 0x2e5   : > { %p1062_p1 = scmp.ne.s32.totalorder %s1433_s5, %s1061_s1  ;;  %p1066_p4 = scmp.lt.u32.totalorder %s1433_s5, %s1537_s17 }
 0x2e6   : > { %p1067_p3 = scmp.lt.u32.totalorder %s1065_s18, %s1061_s1  ;;  %p1069_p10 = scmp.lt.u32.totalorder %s1061_s1, %s1433_s5 }
 0x2e7   : > { %p1063_p9 = pnand %p1062_p1, %p1538_p11 }
 0x2e8   : > { %p1068_p6 = por %p1067_p3, %p1066_p4 }
 0x2e9   : > { %p1064_p7 = pneg %p1063_p9 }
 0x2ea   : > { %p1070_p13 = por %p1069_p10, %p1068_p6 }
 0x2ec   : > { %p1071_p0 = pnand %p1070_p13, %p1064_p7 }
 0x2ee   : > { %1074 = shalt.err (!%p1071_p0)
}
 0x2ef   : > { %852 = dma.vmem_to_hbm [thread:$0]  (%p1538_p11), %s646_s2, 32, %s1433_s5, %s631_s7  }
 0x2f0 PF: > { %s1539_s13 = sld [smem:[#allocation12_spill]]  ;;  %s1540_s11 = sld [smem:[#allocation15_spill]] }
 0x2f1   : > { %p869_p2 = scmp.ge.s32.totalorder %s1173_s28, 2 }
 0x2f6   : > { %s657_s14 = sand.u32 1, %s1539_s13   ;;  %p1541_p5 = scmp.ne.s32.totalorder %s1540_s11, 0 }
 0x2f7   : > { %s658_s15 = scalar_lea.sflag [#allocation5], %s657_s14 }
 0x2f8   : > { %p863_p8 = pnand %p869_p2, %p1541_p5 }
 0x2fa   : > { %1128 = dma.done.wait (!%p863_p8), %s658_s15, 32  }
 0x2fb   : > { %1130 = vsyncadd (!%p863_p8), %s658_s15, 4294967264  ;;  %s22_s28 = sadd.s32 1, %s1173_s28   ;;  %s1542_s12 = sld [smem:[#allocation16_spill]] }
 0x2fc   : > { %p19_p12 = scmp.ge.s32.totalorder %s22_s28, 6   ;;  %s1543_s18 = smov %s1137_s19 }
 0x2fd   : > { %s1544_s19 = smov %s1141_s20  ;;  %s1545_s20 = smov %s1345_s21 }
 0x2fe   : > { %s1546_s21 = smov %s1149_s22  ;;  %s1547_s22 = smov %s1153_s23 }
 0x2ff   : > { %s1548_s23 = smov %s1348_s9  ;;  %s1549_s24 = smov %s1165_s26 }
 0x300   : > { %s1550_s25 = smov %s1169_s27  ;;  %s1552_s27 = smov %s1558_s29 }
 0x301   : > { %s1551_s26 = smov %s1542_s12  ;;  %21 = sbr.rel (!%p19_p12) target bundleno = 16 (0x10), region = 97 }
 0x308   :  { %663 = vsyncpa [#allocation4], 1 }
 0x309   :  { %665 = vsyncpa [#allocation4 + $0x1], 1 }
 0x30a   :  { %666 = vsyncpa [#allocation7], 1 }
 0x30b   :  { %667 = vsyncpa [#allocation5], 1 }
 0x30c   :  { %669 = vsyncpa [#allocation5 + $0x1], 1 }

</bundles_post_ra>
